<compile_context>
chip_gen: v7x
topology: tpu7x:2x2x1
jax: 0.10.0
libtpu: 0.0.40
codegen_flags: <defaults>
</compile_context>

<pallas_src>
import jax
import jax.numpy as jnp
from jax.experimental import pallas as pl
from jax.experimental.pallas import tpu as pltpu


# ----------------------------------------------------------------------------
# AttentionGate
# ----------------------------------------------------------------------------
def attention_gate_kernel(g_ref, x_ref, wgt_ref, wxt_ref, bx_ref,
                          wpsi_ref, bpsi_ref, out_ref):
    # g_ref:   (1, Cg, T)   x_ref: (1, Cl, T)  -- pixels on lanes, channels on sublanes
    # wgt_ref: (Co, Cg)     wxt_ref: (Co, Cl)  -- PyTorch conv-weight layout (Cout, Cin)
    # bx_ref:  (Co, 1)      wpsi_ref: (Co, 1)  bpsi_ref: (1, 1)
    # out_ref: (1, Cl, T)
    g = g_ref[0].astype(jnp.float32)                       # (Cg, T)
    x = x_ref[0]                                           # (Cl, T)
    xf = x.astype(jnp.float32)

    # 1x1 convs as (Co, C) @ (C, T) matmuls on the MXU (K is tiny; MXU has slack).
    g1 = jnp.dot(wgt_ref[...], g, preferred_element_type=jnp.float32)    # (Co, T)
    x1 = jnp.dot(wxt_ref[...], xf, preferred_element_type=jnp.float32)   # (Co, T)
    t = jnp.maximum(g1 + x1 + bx_ref[...], 0.0)            # ReLU; bias broadcast over lanes

    # psi 1x1 conv to a single channel: VPU multiply + cross-sublane (XLU) reduce
    # instead of a degenerate M=1 MXU matmul; sigmoid goes to the EUP.
    psi = jnp.sum(t * wpsi_ref[...], axis=0, keepdims=True) + bpsi_ref[...]   # (1, T)
    alpha = jax.nn.sigmoid(psi)                                               # (1, T)

    # out = x * alpha, alpha broadcast over the Cl sublanes; lane-dense store.
    out_ref[0] = (xf * alpha).astype(out_ref.dtype)


def _pick_tile(HW, bytes_per_lane, tm_pix):
    """Lane-dense pixel tile: multiple of 128, sized so the double-buffered
    VMEM footprint stays well under the default scoped-VMEM limit."""
    if HW < 128:
        return HW
    budget = 12 * 1024 * 1024            # ~12 MiB for pipelined blocks
    max_tile = max(128, budget // max(bytes_per_lane, 1))
    tile = min(tm_pix, HW, max_tile)
    return max(128, (tile // 128) * 128)


def attention_gate_pallas(g_nchw, x_nchw, wgt, wxt, bx, wpsi, bpsi, *, tm_pix=2048):
    """g_nchw: (N, Cg, H, W), x_nchw: (N, Cl, H, W).
    wgt: (Co, Cg), wxt: (Co, Cl), bx: (Co,), wpsi: (Co,), bpsi: (1,).
    Returns (N, Cl, H, W)."""
    N, Cg, H, W = g_nchw.shape
    _, Cl, _, _ = x_nchw.shape
    Co = wgt.shape[0]
    HW = H * W

    # Pure reshapes (no transpose, no extra HBM traffic): NCHW -> (N, C, H*W)
    g3 = g_nchw.reshape(N, Cg, HW)
    x3 = x_nchw.reshape(N, Cl, HW)

    in_itemsize = jnp.dtype(x_nchw.dtype).itemsize
    # double-buffered g/x/out blocks + f32 intermediates (g1, x1, t) per lane
    bytes_per_lane = 2 * (Cg + 2 * Cl) * in_itemsize + (3 * Co + Cg + Cl) * 4
    tile = _pick_tile(HW, bytes_per_lane, tm_pix)
    grid = (N, pl.cdiv(HW, tile))

    bx2 = bx.reshape(Co, 1)
    wpsi2 = wpsi.reshape(Co, 1)
    bpsi2 = bpsi.reshape(1, 1)

    out3 = pl.pallas_call(
        attention_gate_kernel,
        out_shape=jax.ShapeDtypeStruct((N, Cl, HW), x_nchw.dtype),
        grid_spec=pltpu.PrefetchScalarGridSpec(
            num_scalar_prefetch=0,
            grid=grid,
            in_specs=[
                pl.BlockSpec((1, Cg, tile), lambda n, i: (n, 0, i)),   # g pixels
                pl.BlockSpec((1, Cl, tile), lambda n, i: (n, 0, i)),   # x pixels
                pl.BlockSpec((Co, Cg), lambda n, i: (0, 0)),           # W_g  (Cout, Cin)
                pl.BlockSpec((Co, Cl), lambda n, i: (0, 0)),           # W_x  (Cout, Cin)
                pl.BlockSpec((Co, 1), lambda n, i: (0, 0)),            # b_x
                pl.BlockSpec((Co, 1), lambda n, i: (0, 0)),            # W_psi
                pl.BlockSpec((1, 1), lambda n, i: (0, 0)),             # b_psi
            ],
            out_specs=pl.BlockSpec((1, Cl, tile), lambda n, i: (n, 0, i)),
        ),
        compiler_params=pltpu.CompilerParams(
            dimension_semantics=("parallel", "parallel")),
    )(g3, x3, wgt, wxt, bx2, wpsi2, bpsi2)

    return out3.reshape(N, Cl, H, W)


# ----------------------------------------------------------------------------
# OutConv: 1x1 conv + bias + ReLU
# ----------------------------------------------------------------------------
def outconv_kernel(x_ref, w_ref, b_ref, out_ref):
    # x_ref: (1, Cin, T)   w_ref: (Cout, Cin)   b_ref: (Cout, 1)   out_ref: (1, Cout, T)
    x = x_ref[0].astype(jnp.float32)
    y = jnp.dot(w_ref[...], x, preferred_element_type=jnp.float32) + b_ref[...]
    out_ref[0] = jnp.maximum(y, 0.0).astype(out_ref.dtype)


def outconv_pallas(x_nchw, w, b, *, tm_pix=2048):
    """x_nchw: (N, Cin, H, W), w: (Cout, Cin), b: (Cout,). Returns (N, Cout, H, W)."""
    N, Cin, H, W = x_nchw.shape
    Cout = w.shape[0]
    HW = H * W

    x3 = x_nchw.reshape(N, Cin, HW)
    in_itemsize = jnp.dtype(x_nchw.dtype).itemsize
    bytes_per_lane = 2 * (Cin + Cout) * in_itemsize + (Cin + Cout) * 4
    tile = _pick_tile(HW, bytes_per_lane, tm_pix)
    grid = (N, pl.cdiv(HW, tile))

    b2 = b.reshape(Cout, 1)

    out3 = pl.pallas_call(
        outconv_kernel,
        out_shape=jax.ShapeDtypeStruct((N, Cout, HW), x_nchw.dtype),
        grid_spec=pltpu.PrefetchScalarGridSpec(
            num_scalar_prefetch=0,
            grid=grid,
            in_specs=[
                pl.BlockSpec((1, Cin, tile), lambda n, i: (n, 0, i)),
                pl.BlockSpec((Cout, Cin), lambda n, i: (0, 0)),
                pl.BlockSpec((Cout, 1), lambda n, i: (0, 0)),
            ],
            out_specs=pl.BlockSpec((1, Cout, tile), lambda n, i: (n, 0, i)),
        ),
        compiler_params=pltpu.CompilerParams(
            dimension_semantics=("parallel", "parallel")),
    )(x3, w, b2)

    return out3.reshape(N, Cout, H, W)


# ----------------------------------------------------------------------------
# Pure-JAX references (match the PyTorch modules)
# ----------------------------------------------------------------------------
def attention_gate_ref(g_nchw, x_nchw, wgt, wxt, bx, wpsi, bpsi):
    g1 = jnp.einsum('oc,nchw->nohw', wgt, g_nchw)
    x1 = jnp.einsum('oc,nchw->nohw', wxt, x_nchw) + bx[None, :, None, None]
    t = jnp.maximum(g1 + x1, 0.0)
    psi = jnp.einsum('o,nohw->nhw', wpsi, t)[:, None, :, :] + bpsi.reshape(1, 1, 1, 1)
    alpha = jax.nn.sigmoid(psi)
    return x_nchw * alpha


def outconv_ref(x_nchw, w, b):
    y = jnp.einsum('oc,nchw->nohw', w, x_nchw) + b[None, :, None, None]
    return jnp.maximum(y, 0.0)


if __name__ == "__main__":
    key = jax.random.PRNGKey(0)
    ks = jax.random.split(key, 12)

    # --- AttentionGate (small shapes mirroring Up.attention_gate) ---
    N, Cg, Cl, Co, H, W = 2, 4, 4, 8, 16, 16
    g = jax.random.normal(ks[0], (N, Cg, H, W), dtype=jnp.float32)
    x = jax.random.normal(ks[1], (N, Cl, H, W), dtype=jnp.float32)
    # 1x1-conv parameters in PyTorch-native layout: weight[:, :, 0, 0] = (Cout, Cin).
    wgt = 0.1 * jax.random.normal(ks[2], (Co, Cg), dtype=jnp.float32)
    wxt = 0.1 * jax.random.normal(ks[3], (Co, Cl), dtype=jnp.float32)
    bx = 0.05 * jax.random.normal(ks[4], (Co,), dtype=jnp.float32)
    wpsi = 0.1 * jax.random.normal(ks[5], (Co,), dtype=jnp.float32)
    bpsi = 0.05 * jax.random.normal(ks[6], (1,), dtype=jnp.float32)

    out = jax.block_until_ready(attention_gate_pallas(g, x, wgt, wxt, bx, wpsi, bpsi))
    ref = attention_gate_ref(g, x, wgt, wxt, bx, wpsi, bpsi)
    assert out.shape == (N, Cl, H, W)
    assert jnp.allclose(out, ref, atol=1e-5, rtol=1e-5)

    # Ragged spatial extent (exercises the Pallas edge-tile path).
    H2, W2 = 10, 13
    g2 = jax.random.normal(ks[7], (N, Cg, H2, W2), dtype=jnp.float32)
    x2 = jax.random.normal(ks[8], (N, Cl, H2, W2), dtype=jnp.float32)
    out2 = jax.block_until_ready(attention_gate_pallas(g2, x2, wgt, wxt, bx, wpsi, bpsi))
    ref2 = attention_gate_ref(g2, x2, wgt, wxt, bx, wpsi, bpsi)
    assert jnp.allclose(out2, ref2, atol=1e-5, rtol=1e-5)

    # --- OutConv (1x1 conv + bias + ReLU), out_channels=7 like the model head ---
    Cin_o, Cout_o = 4, 7
    xo = jax.random.normal(ks[9], (N, Cin_o, H, W), dtype=jnp.float32)
    wo = 0.1 * jax.random.normal(ks[10], (Cout_o, Cin_o), dtype=jnp.float32)
    bo = 0.05 * jax.random.normal(ks[11], (Cout_o,), dtype=jnp.float32)
    oo = jax.block_until_ready(outconv_pallas(xo, wo, bo))
    oref = outconv_ref(xo, wo, bo)
    assert oo.shape == (N, Cout_o, H, W)
    assert jnp.allclose(oo, oref, atol=1e-5, rtol=1e-5)

    print("KERNEL_OK")
</pallas_src>

<mosaic_0001>
module attributes {stable_mosaic.version = 11 : i64} {
  func.func @attention_gate_kernel(%arg0: i32, %arg1: i32, %arg2: memref<1x4x256xf32, #tpu.memory_space<vmem>>, %arg3: memref<1x4x256xf32, #tpu.memory_space<vmem>>, %arg4: memref<8x4xf32, #tpu.memory_space<vmem>>, %arg5: memref<8x4xf32, #tpu.memory_space<vmem>>, %arg6: memref<8x1xf32, #tpu.memory_space<vmem>>, %arg7: memref<8x1xf32, #tpu.memory_space<vmem>>, %arg8: memref<1x1xf32, #tpu.memory_space<vmem>>, %arg9: memref<1x4x256xf32, #tpu.memory_space<vmem>>) attributes {dimension_semantics = [#tpu.dimension_semantics<parallel>, #tpu.dimension_semantics<parallel>], iteration_bounds = array<i64: 2, 1>, scalar_prefetch = 0 : i64, scratch_operands = 0 : i64, tpu.core_type = #tpu.core_type<tc>, window_params = [{transform_indices = @transform_0, window_bounds = array<i64: 1, 4, 256>}, {transform_indices = @transform_1, window_bounds = array<i64: 1, 4, 256>}, {pipeline_mode = #tpu.pipeline_mode<synchronous>, transform_indices = @transform_2, window_bounds = array<i64: 8, 4>}, {pipeline_mode = #tpu.pipeline_mode<synchronous>, transform_indices = @transform_3, window_bounds = array<i64: 8, 4>}, {pipeline_mode = #tpu.pipeline_mode<synchronous>, transform_indices = @transform_4, window_bounds = array<i64: 8, 1>}, {pipeline_mode = #tpu.pipeline_mode<synchronous>, transform_indices = @transform_5, window_bounds = array<i64: 8, 1>}, {pipeline_mode = #tpu.pipeline_mode<synchronous>, transform_indices = @transform_6, window_bounds = array<i64: 1, 1>}, {transform_indices = @transform_7, window_bounds = array<i64: 1, 4, 256>}]} {
    %c0 = arith.constant 0 : index
    %c0_0 = arith.constant 0 : index
    %c0_1 = arith.constant 0 : index
    %0 = vector.load %arg2[%c0, %c0_0, %c0_1] : memref<1x4x256xf32, #tpu.memory_space<vmem>>, vector<1x4x256xf32>
    %1 = vector.shape_cast %0 : vector<1x4x256xf32> to vector<4x256xf32>
    %c0_2 = arith.constant 0 : index
    %c0_3 = arith.constant 0 : index
    %c0_4 = arith.constant 0 : index
    %2 = vector.load %arg3[%c0_2, %c0_3, %c0_4] : memref<1x4x256xf32, #tpu.memory_space<vmem>>, vector<1x4x256xf32>
    %3 = vector.shape_cast %2 : vector<1x4x256xf32> to vector<4x256xf32>
    %c0_5 = arith.constant 0 : index
    %c0_6 = arith.constant 0 : index
    %4 = vector.load %arg4[%c0_5, %c0_6] : memref<8x4xf32, #tpu.memory_space<vmem>>, vector<8x4xf32>
    %cst = arith.constant dense<0.000000e+00> : vector<8x256xf32>
    %5 = tpu.matmul %4, %1, %cst {dimension_numbers = #tpu.dot_dimension_numbers<[1], [0], [0], [1], [0, 0, 1, 1], [], []>} : vector<8x4xf32>, vector<4x256xf32>, vector<8x256xf32> -> vector<8x256xf32>
    %c0_7 = arith.constant 0 : index
    %c0_8 = arith.constant 0 : index
    %6 = vector.load %arg5[%c0_7, %c0_8] : memref<8x4xf32, #tpu.memory_space<vmem>>, vector<8x4xf32>
    %cst_9 = arith.constant dense<0.000000e+00> : vector<8x256xf32>
    %7 = tpu.matmul %6, %3, %cst_9 {dimension_numbers = #tpu.dot_dimension_numbers<[1], [0], [0], [1], [0, 0, 1, 1], [], []>} : vector<8x4xf32>, vector<4x256xf32>, vector<8x256xf32> -> vector<8x256xf32>
    %8 = arith.addf %5, %7 : vector<8x256xf32>
    %c0_10 = arith.constant 0 : index
    %c0_11 = arith.constant 0 : index
    %9 = vector.load %arg6[%c0_10, %c0_11] : memref<8x1xf32, #tpu.memory_space<vmem>>, vector<8x1xf32>
    %10 = vector.broadcast %9 : vector<8x1xf32> to vector<8x256xf32>
    %11 = arith.addf %8, %10 : vector<8x256xf32>
    %cst_12 = arith.constant 0.000000e+00 : f32
    %12 = vector.broadcast %cst_12 : f32 to vector<8x256xf32>
    %13 = arith.maximumf %11, %12 : vector<8x256xf32>
    %c0_13 = arith.constant 0 : index
    %c0_14 = arith.constant 0 : index
    %14 = vector.load %arg7[%c0_13, %c0_14] : memref<8x1xf32, #tpu.memory_space<vmem>>, vector<8x1xf32>
    %15 = vector.broadcast %14 : vector<8x1xf32> to vector<8x256xf32>
    %16 = arith.mulf %13, %15 : vector<8x256xf32>
    %cst_15 = arith.constant dense<0.000000e+00> : vector<256xf32>
    %17 = vector.multi_reduction <add>, %16, %cst_15 [0] : vector<8x256xf32> to vector<256xf32>
    %18 = vector.shape_cast %17 : vector<256xf32> to vector<1x256xf32>
    %c0_16 = arith.constant 0 : index
    %c0_17 = arith.constant 0 : index
    %19 = vector.load %arg8[%c0_16, %c0_17] : memref<1x1xf32, #tpu.memory_space<vmem>>, vector<1x1xf32>
    %20 = vector.broadcast %19 : vector<1x1xf32> to vector<1x256xf32>
    %21 = arith.addf %18, %20 : vector<1x256xf32>
    %22 = arith.negf %21 : vector<1x256xf32>
    %23 = math.exp %22 : vector<1x256xf32>
    %cst_18 = arith.constant 1.000000e+00 : f32
    %24 = vector.broadcast %cst_18 : f32 to vector<1x256xf32>
    %25 = arith.addf %24, %23 : vector<1x256xf32>
    %26 = arith.divf %24, %25 : vector<1x256xf32>
    %27 = vector.broadcast %26 : vector<1x256xf32> to vector<4x256xf32>
    %28 = arith.mulf %3, %27 : vector<4x256xf32>
    %c0_19 = arith.constant 0 : index
    %c0_20 = arith.constant 0 : index
    %c0_21 = arith.constant 0 : index
    %29 = vector.load %arg9[%c0_19, %c0_20, %c0_21] : memref<1x4x256xf32, #tpu.memory_space<vmem>>, vector<1x4x256xf32>
    %30 = vector.shape_cast %29 : vector<1x4x256xf32> to vector<4x256xf32>
    %31 = vector.shape_cast %28 : vector<4x256xf32> to vector<1x4x256xf32>
    tpu.vector_store %arg9[%c0_19, %c0_20, %c0_21], %31 {strides = array<i32>} : memref<1x4x256xf32, #tpu.memory_space<vmem>>, vector<1x4x256xf32>,
    return
  }
  func.func @transform_0(%arg0: i32, %arg1: i32) -> (i32, i32, i32) {
    %c0_i32 = arith.constant 0 : i32
    %c0_i32_0 = arith.constant 0 : i32
    return %arg0, %c0_i32, %arg1 : i32, i32, i32
  }
  func.func @transform_1(%arg0: i32, %arg1: i32) -> (i32, i32, i32) {
    %c0_i32 = arith.constant 0 : i32
    %c0_i32_0 = arith.constant 0 : i32
    return %arg0, %c0_i32, %arg1 : i32, i32, i32
  }
  func.func @transform_2(%arg0: i32, %arg1: i32) -> (i32, i32) {
    %c0_i32 = arith.constant 0 : i32
    %c0_i32_0 = arith.constant 0 : i32
    %c0_i32_1 = arith.constant 0 : i32
    return %c0_i32, %c0_i32_0 : i32, i32
  }
  func.func @transform_3(%arg0: i32, %arg1: i32) -> (i32, i32) {
    %c0_i32 = arith.constant 0 : i32
    %c0_i32_0 = arith.constant 0 : i32
    %c0_i32_1 = arith.constant 0 : i32
    return %c0_i32, %c0_i32_0 : i32, i32
  }
  func.func @transform_4(%arg0: i32, %arg1: i32) -> (i32, i32) {
    %c0_i32 = arith.constant 0 : i32
    %c0_i32_0 = arith.constant 0 : i32
    %c0_i32_1 = arith.constant 0 : i32
    return %c0_i32, %c0_i32_0 : i32, i32
  }
  func.func @transform_5(%arg0: i32, %arg1: i32) -> (i32, i32) {
    %c0_i32 = arith.constant 0 : i32
    %c0_i32_0 = arith.constant 0 : i32
    %c0_i32_1 = arith.constant 0 : i32
    return %c0_i32, %c0_i32_0 : i32, i32
  }
  func.func @transform_6(%arg0: i32, %arg1: i32) -> (i32, i32) {
    %c0_i32 = arith.constant 0 : i32
    %c0_i32_0 = arith.constant 0 : i32
    %c0_i32_1 = arith.constant 0 : i32
    return %c0_i32, %c0_i32_0 : i32, i32
  }
  func.func @transform_7(%arg0: i32, %arg1: i32) -> (i32, i32, i32) {
    %c0_i32 = arith.constant 0 : i32
    %c0_i32_0 = arith.constant 0 : i32
    return %arg0, %c0_i32, %arg1 : i32, i32, i32
  }
}

</mosaic_0001>

<bundles_post_ra>
// kernel: tpu_custom_call.1
= control target key start
LH: loop header
LB: loop body
LE: loop exit
PB: predicated region body
PF: predicated region fallthrough
CT: control target
= control target key end

     0   :  { %s1039_s0 = inlined_call_operand.vmem [shape: f32[2,4,256], index: 0, kind: input, shape index: {}]   ;;  %s1040_s1 = inlined_call_operand.vmem [shape: f32[2,4,256], index: 1, kind: input, shape index: {}]   ;;  %s1041_s2 = inlined_call_operand.vmem [shape: f32[8,4], index: 2, kind: input, shape index: {}]   ;;  %s1042_s3 = inlined_call_operand.vmem [shape: f32[8,4], index: 3, kind: input, shape index: {}]   ;;  %s1043_s4 = inlined_call_operand.vmem [shape: f32[8,1], index: 4, kind: input, shape index: {}]   ;;  %s1044_s5 = inlined_call_operand.vmem [shape: f32[8,1], index: 5, kind: input, shape index: {}]   ;;  %s1045_s6 = inlined_call_operand.<no memory space> [shape: f32[1,1], index: 6, kind: input, shape index: {}]   ;;  %s1046_s7 = inlined_call_operand.hbm [shape: f32[2,4,256], index: 7, kind: output, shape index: {}]  }
   0x1   :  { %v12_v0 = vstv %s1045_s6 }
   0x2   :  { %13 = vst [vmem:[#allocation2] sm:$0x1] %v12_v0 }
   0x3   :  { %14 = vsyncpa [#allocation4], 0 }
   0x4   :  { %16 = vsyncpa [#allocation4 + $0x1], 0  ;;  %s906_s26 = smov 0   ;;  %s908_s27 = smov 0  }
   0x5   :  { %s910_s28 = smov 0   ;;  %s912_s29 = smov 0  }
   0x6   :  { %s914_s30 = smov 0   ;;  %s916_s8 = smov 0  }
   0x7 LB: > { %s683_s6 = sadd.s32 4294967295, %s858_s8   ;;  %s684_s9 = sadd.s32 4294967294, %s858_s8   ;;  %s858_s8 = sphi %s916_s8, %s22_s8   ;;  %s854_s30 = sphi %s914_s30, %s1053_s30   ;;  %s850_s29 = sphi %s912_s29, %s1052_s29   ;;  %s846_s28 = sphi %s910_s28, %s1051_s28   ;;  %s842_s27 = sphi %s908_s27, %s1050_s27   ;;  %s838_s26 = sphi %s906_s26, %s1049_s26  }
   0x8   : > { %s34_s10 = sadd.s32 1, %s854_s30  ;;  %s204_s11 = sadd.s32 1, %s846_s28 }
   0x9   : > { %p36_p0 = scmp.ge.s32.totalorder %s34_s10, 2  ;;  %p214_p1 = scmp.ne.s32.totalorder %s846_s28, %s842_s27 }
   0xa   : > { %p215_p2 = scmp.eq.s32.totalorder %s683_s6, 1  ;;  %p220_p3 = scmp.ne.s32.totalorder %s842_s27, %s838_s26 }
   0xb   : > { %s1055_s10 = smov (%p36_p0, %s34_s10), 0  ;;  %p221_p5 = scmp.eq.s32.totalorder %s684_s9, 1 }
   0xc   : > { %p946_p4 = por %p215_p2, %p214_p1  ;;  %s199_s13 = ssub.s32 %s854_s30, %s1055_s10 }
   0xd   : > { %p687_p6 = scmp.ge.s32.totalorder %s858_s8, 1  ;;  %p202_p7 = scmp.eq.s32.totalorder %s199_s13, 0 }
   0xe   : > { %p953_p8 = por %p221_p5, %p220_p3  ;;  %p280_p9 = scmp.lt.s32.totalorder %s858_s8, 3 }
   0xf   : > { %s959_s15 = scalar_select %p202_p7, %s846_s28, %s204_s11  }
  0x10   : > { %p281_p10 = pnand %p687_p6, %p280_p9 }
  0x11   : > { %p326_p11 = scmp.lt.s32.totalorder (!%p281_p10), %s850_s29, 1  ;;  %v860_v1 = vmov (!%p281_p10), 0.0   ;;  %v512_v2 = vld [vmem:[%s1043_s4] sm:$0xff] (!%p281_p10)  ;;  %v861_v4 = vmov (!%p281_p10), 0   ;;  %vm356_vm0 = vcmask (!%p281_p10), 1043456   ;;  %vm352_vm1 = vcmask (!%p281_p10), 31744  }
  0x12   : > { %284 = sbr.rel (%p281_p10) target bundleno = 314 (0x13a), region = 48  ;;  %425 = vmatprep.mubr.f32.mxu1 (!%p281_p10), %v860_v1  ;;  %505 = vmatprep.mubr.f32.mxu0 (!%p281_p10), %v860_v1  ;;  %v542_v3 = vld [vmem:[#allocation2] sm:$0x1] (!%p281_p10)  ;;  %v548_v22 = vlaneseq (!%p281_p10)  ;;  %s708_s20 = sshll.u32 (!%p281_p10), %s850_s29, 7 }
  0x13   : > { %768 = vset.pattern.permute.xlu0 (!%p281_p10), %v861_v4  ;;  %769 = vset.pattern.permute.xlu1 (!%p281_p10), %v861_v4  ;;  %v522_v5 = vld [vmem:[%s1044_s5] sm:$0xff] (!%p281_p10)  ;;  %s992_s25 = scalar_lea.hbm (!%p281_p10), %s1046_s7, %s708_s20 }
  0x14   : > { %515 = vperm.xlu0 (!%p281_p10), %768, %v512_v2   ;;  %545 = vperm.xlu1 (!%p281_p10), %769, %v542_v3   ;;  %v349_v10 = vld [vmem:[%s1042_s3] sm:$0xff] (!%p281_p10)  ;;  %v549_v28 = vshrl.u32 (!%p281_p10), %v548_v22, 7 }
  0x15   : > { %v348_v11 = vld [vmem:[%s1041_s2] sm:$0xff] (!%p281_p10) }
  0x16   : > { %v550_v33 = vsub.s32 (!%p281_p10), 0, %v549_v28 }
  0x18   : > { %525 = vperm.xlu0 (!%p281_p10), %768, %v522_v5  }
  0x19   : > { %s327_s18 = scalar_select %p326_p11, %s850_s29, 1 }
  0x1a   : > { %s862_s29 = smov [#allocation3]  }
  0x1b   : > { %s706_s19 = sshll.u32 %s327_s18, 3  ;;  %s322_s18 = sand.u32 1, %s842_s27  }
  0x1c   : > { %s343_s24 = scalar_lea.vmem %s1040_s1, %s706_s19  ;;  %s333_s9 = scalar_lea.vmem %s1039_s0, %s706_s19 }
  0x1d   : > { %v975_v6 = vld [vmem:[%s343_s24] sm:$0xff]  ;;  %s688_s19 = sshll.u32 %s322_s18, 3  ;;  %s573_s6 = scalar_lea.sflag [#allocation4], %s322_s18 }
  0x1e   : > { %v346_v7 = vld [vmem:[%s333_s9] sm:$0xff]  ;;  %v351_v8 = vcombine.high %v975_v6, %v975_v6  ;;  %s324_s21 = scalar_lea.vmem [#allocation3], %s688_s19  ;;  %s784_s11 = sshll.u32 %s862_s29, 4  ;;  %s785_s11 = int_to_ptr.vmem [resolvable:$false] %s784_s11 }
  0x1f   : > { %v433_v9 = vcombine.high %v346_v7, %v346_v7  ;;  %s589_s22 = sshll.u32 %s324_s21, 4  ;;  %s786_s13 = scalar_lea.vmem %s785_s11, 256  ;;  %s994_s22 = int_to_ptr.vmem [resolvable:$true] %s589_s22 }
  0x20   : > { %693 = vmatprep.subr.msk.mxu1 %vm356_vm0, %v351_v8  ;;  %s780_s9 = scalar_lea.vmem %s994_s22, 128  ;;  %p787_p1 = scmp.lt.s32.totalorder %s994_s22, %s785_s11 }
  0x21   : > { %696 = vmatprep.subr.msk.mxu0 %vm356_vm0, %v433_v9  ;;  %694 = vmatpush1.msk.msra.mxu1 %vm356_vm0, %v975_v6  ;;  %p781_p12 = scmp.ne.s32.totalorder %s994_s22, %s780_s9  ;;  %p788_p2 = scmp.lt.s32.totalorder %s786_s13, %s780_s9 }
  0x22   : > { %697 = vmatpush1.msk.msra.mxu0 %vm356_vm0, %v346_v7  ;;  %695 = vmatmul.mubr.msk.f32.vlgmr.msra.gmra.mrb[0].mxu1 %vm352_vm1, %v349_v10 }
  0x23   : > { %698 = vmatmul.mubr.msk.f32.vlgmr.msra.gmra.mrb[0].mxu0 %vm352_vm1, %v348_v11  ;;  %p782_p13 = pnand %p781_p12, %p946_p4  ;;  %p789_p3 = por %p788_p2, %p787_p1 }
  0x25   : > { %p783_p0 = pneg %p782_p13 }
  0x27   : > { %p790_p5 = pnand %p789_p3, %p783_p0 }
  0x93   : > { %v516_v12 = vpop.permute.xlu0 %515  ;;  %v546_v35 = vpop.permute.xlu1 %545 }
  0x94   : > { %v551_v39 = vrot.slane %v546_v35, %v550_v33 }
  0x97   : > { %v526_v23 = vpop.permute.xlu0 %525 }
  0xf5   : > { %v427_v13 = vpop.f32.mrb[0].mxu1 }
  0xf6   : > { %v507_v14 = vpop.f32.mrb[0].mxu0  ;;  %v429_v16 = vpop.f32.mrb[1].mxu1 }
  0xf7   : > { %v508_v15 = vadd.f32 %v507_v14, %v427_v13  ;;  %v509_v17 = vpop.f32.mrb[1].mxu0 }
  0xf8   : > { %v510_v18 = vadd.f32 %v509_v17, %v429_v16 }
  0xf9   : > { %v518_v19 = vadd.f32 %v516_v12, %v508_v15 }
  0xfa   : > { %v519_v20 = vadd.f32 %v516_v12, %v510_v18 }
  0xfb   : > { %v520_v21 = vmax.f32 %v518_v19, 0.0 }
  0xfc   : > { %v521_v24 = vmax.f32 %v519_v20, 0.0 }
  0xfd   : > { %v528_v25 = vmul.f32 %v526_v23, %v520_v21 }
  0xfe   : > { %v529_v26 = vmul.f32 %v526_v23, %v521_v24 }
  0xff   : > { %v530_v27 = vrot.slane %v528_v25, 4 }
 0x100   : > { %v536_v29 = vrot.slane %v529_v26, 4 }
 0x101   : > { %v531_v30 = vadd.f32 %v530_v27, %v528_v25 }
 0x102   : > { %v537_v31 = vadd.f32 %v536_v29, %v529_v26 }
 0x103   : > { %v532_v32 = vrot.slane %v531_v30, 2 }
 0x104   : > { %v538_v34 = vrot.slane %v537_v31, 2 }
 0x105   : > { %v533_v36 = vadd.f32 %v532_v32, %v531_v30 }
 0x106   : > { %v539_v37 = vadd.f32 %v538_v34, %v537_v31 }
 0x107   : > { %v534_v38 = vrot.slane %v533_v36, 1 }
 0x108   : > { %v540_v40 = vrot.slane %v539_v37, 1 }
 0x109   : > { %v535_v41 = vadd.f32 %v534_v38, %v533_v36 }
 0x10a   : > { %v541_v42 = vadd.f32 %v540_v40, %v539_v37 }
 0x10b   : > { %v552_v43 = vadd.f32 %v551_v39, %v535_v41 }
 0x10c   : > { %v553_v44 = vadd.f32 %v551_v39, %v541_v42 }
 0x10d   : > { %v699_v45 = vmul.f32 -1.442695, %v552_v43 }
 0x10e   : > { %v700_v46 = vmul.f32 -1.442695, %v553_v44 }
 0x10f   : > { %772 = vpow2.f32 %v699_v45 }
 0x110   : > { %774 = vpow2.f32 %v700_v46 }
 0x119   : > { %v773_v47 = vpop.eup %772 }
 0x11a   : > { %v775_v48 = vpop.eup %774  ;;  %v560_v49 = vadd.f32 1.0, %v773_v47 }
 0x11b   : > { %v561_v50 = vadd.f32 1.0, %v775_v48 }
 0x11c   : > { %776 = vrcp.f32 %v560_v49 }
 0x11d   : > { %778 = vrcp.f32 %v561_v50 }
 0x126   : > { %v777_v51 = vpop.eup %776 }
 0x127   : > { %v779_v52 = vpop.eup %778 }
 0x128   : > { %v568_v53 = vcombine.low %v777_v51, %v779_v52 }
 0x12a   : > { %v570_v54 = vmul.f32 %v568_v53, %v975_v6 }
 0x12c   : > { %571 = vst [vmem:[%s324_s21] sm:$0xff] %v570_v54 }
 0x12d   : > { %793 = shalt.err (!%p790_p5)
}
 0x12e   : > { %s794_s16 = scalar_lea.hbm %s992_s25, 128  ;;  %s798_s19 = scalar_lea.hbm %s1046_s7, 256 }
 0x12f   : > { %p795_p6 = scmp.ne.s32.totalorder %s992_s25, %s794_s16  ;;  %p799_p10 = scmp.lt.u32.totalorder %s992_s25, %s1046_s7 }
 0x130   : > { %p800_p11 = scmp.lt.u32.totalorder %s798_s19, %s794_s16  ;;  %p802_p13 = scmp.lt.u32.totalorder %s794_s16, %s992_s25 }
 0x131   : > { %p796_p7 = pnand %p795_p6, %p946_p4 }
 0x132   : > { %p801_p12 = por %p800_p11, %p799_p10 }
 0x133   : > { %p797_p9 = pneg %p796_p7 }
 0x134   : > { %p803_p0 = por %p802_p13, %p801_p12 }
 0x136   : > { %p804_p1 = pnand %p803_p0, %p797_p9 }
 0x138   : > { %807 = shalt.err (!%p804_p1)
}
 0x139   : > { %711 = dma.vmem_to_hbm [thread:$0]  (%p946_p4), %s994_s22, 128, %s992_s25, %s573_s6  }
 0x13a PF: > { %p717_p2 = scmp.ge.s32.totalorder %s858_s8, 2  ;;  %s601_s23 = sand.u32 1, %s838_s26  }
 0x13b   : > { %s602_s24 = scalar_lea.sflag [#allocation4], %s601_s23 }
 0x13c   : > { %p714_p3 = pnand %p717_p2, %p953_p8 }
 0x13e   : > { %833 = dma.done.wait (!%p714_p3), %s602_s24, 128  }
 0x13f   : > { %835 = vsyncadd (!%p714_p3), %s602_s24, 4294967168  ;;  %s22_s8 = sadd.s32 1, %s858_s8   ;;  %s1049_s26 = smov %s842_s27 }
 0x140   : > { %p19_p5 = scmp.ge.s32.totalorder %s22_s8, 4   ;;  %s1050_s27 = smov %s846_s28 }
 0x141   : > { %s1051_s28 = smov %s959_s15  ;;  %s1052_s29 = smov %s854_s30 }
 0x142   : > { %s1053_s30 = smov %s1055_s10  ;;  %21 = sbr.rel (!%p19_p5) target bundleno = 7 (0x7), region = 86 }
 0x149   :  { %607 = vsyncpa [#allocation4], 1 }
 0x14a   :  { %609 = vsyncpa [#allocation4 + $0x1], 1 }

</bundles_post_ra>
